<compile_context>
chip_gen: v6e
topology: v6e:2x2x1
jax: 0.10.0
libtpu: 0.0.40
codegen_flags: <defaults>
</compile_context>

<pallas_src>
import jax
import jax.numpy as jnp
from jax import lax
from jax.experimental import pallas as pl
from jax.experimental.pallas import tpu as pltpu


def _round_up(x: int, m: int) -> int:
    return -(-x // m) * m


def _vmem_capacity_bytes() -> int:
    """Physical VMEM per TensorCore; conservative 64 MiB fallback (v7x)."""
    try:
        cap = int(getattr(pltpu.get_tpu_info(), "vmem_capacity_bytes", 0))
        if cap > 0:
            return cap
    except Exception:
        pass
    return 64 * 1024 * 1024


def _make_loss_kernel(tile_b: int, tile_c: int, b: int, c: int):
    mask_rows = (b % tile_b) != 0   # last row tile is ragged (or tile_b > b)
    mask_cols = (c % tile_c) != 0   # last class tile is ragged

    def kernel(f_ref, l_ref, o_ref, acc_ref):
        i = pl.program_id(0)                      # row-tile index ("parallel")
        k = pl.program_id(1)                      # class-tile index (reduction)

        @pl.when(k == 0)
        def _():
            acc_ref[...] = jnp.zeros_like(acc_ref)

        f = f_ref[...].astype(jnp.float32)
        l = l_ref[...].astype(jnp.float32)

        # Guard -log(0)*0 -> NaN at unlabeled positions; also masks out any
        # garbage loaded for out-of-bounds rows/columns of ragged tiles.
        valid = l != 0.0
        if mask_rows:
            rows = lax.broadcasted_iota(jnp.int32, (tile_b, tile_c), 0) + i * tile_b
            valid = jnp.logical_and(valid, rows < b)
        if mask_cols:
            cols = lax.broadcasted_iota(jnp.int32, (tile_b, tile_c), 1) + k * tile_c
            valid = jnp.logical_and(valid, cols < c)

        contrib = jnp.where(valid, -jnp.log(f) * l, 0.0)

        # vreg-folded accumulation: (tile_b, tile_c) -> (8, tile_c), pure VALU.
        acc_ref[...] += contrib.reshape(tile_b // 8, 8, tile_c).sum(axis=0)

        @pl.when(k == pl.num_programs(1) - 1)
        def _():
            # One small reduction per row tile, written once to SMEM.
            o_ref[0, 0] = jnp.sum(acc_ref[...])

    return kernel


def softmax_loss(features: jax.Array, labels: jax.Array) -> jax.Array:
    b, c = features.shape
    assert labels.shape == (b, c)

    f_isz = jnp.dtype(features.dtype).itemsize
    l_isz = jnp.dtype(labels.dtype).itemsize
    max_isz = max(f_isz, l_isz)
    # Minimum sublane multiple for the narrowest streamed dtype
    # (8 for 32-bit, 16 for 16-bit, 32 for 8-bit).
    sublane = max(8, 32 // min(f_isz, l_isz))

    # ---- generation-aware VMEM budget --------------------------------------
    cap = _vmem_capacity_bytes()                  # 64 MiB v7x, 128 MiB v5e/v6e
    budget = (cap * 5) // 8                       # ~40 MiB v7x, ~80 MiB v5e/v6e
    # ~4 MiB per input block saturates the HBM roofline; never exceed budget/5
    # (2 inputs x 2 pipeline buffers + accumulator + headroom).
    target_block = min(4 << 20, max(1 << 20, budget // 5))

    # ---- tile selection ------------------------------------------------------
    if sublane * c * max_isz <= target_block:
        tile_c = c                                # full rows fit comfortably
    else:
        # Huge class count: tile C in multiples of 128 lanes.
        tile_c = min(target_block // (sublane * max_isz), 16384)
        tile_c = max(128, (tile_c // 128) * 128)
        tile_c = min(tile_c, _round_up(c, 128))
    tile_b = target_block // (tile_c * max_isz)
    tile_b = max(sublane, (tile_b // sublane) * sublane)
    tile_b = min(tile_b, _round_up(b, sublane))

    n_row_tiles = -(-b // tile_b)
    n_c_tiles = -(-c // tile_c)

    # ---- declared VMEM limit (footprint + headroom, generation-aware cap) ---
    footprint = 2 * tile_b * tile_c * (f_isz + l_isz) + 8 * tile_c * 4
    vmem_limit = footprint + footprint // 4 + (2 << 20)
    vmem_limit = int(min(max(vmem_limit, 16 << 20), cap - (16 << 20)))

    kernel = _make_loss_kernel(tile_b, tile_c, b, c)

    cost = pl.CostEstimate(
        flops=5 * b * c,
        transcendentals=b * c,
        bytes_accessed=b * c * (f_isz + l_isz) + n_row_tiles * 4,
    )

    partials = pl.pallas_call(
        kernel,
        out_shape=jax.ShapeDtypeStruct((1, n_row_tiles), jnp.float32),
        grid_spec=pltpu.PrefetchScalarGridSpec(
            num_scalar_prefetch=0,
            grid=(n_row_tiles, n_c_tiles),
            in_specs=[
                pl.BlockSpec((tile_b, tile_c), lambda i, k: (i, k)),
                pl.BlockSpec((tile_b, tile_c), lambda i, k: (i, k)),
            ],
            out_specs=pl.BlockSpec((1, 1), lambda i, k: (0, i),
                                   memory_space=pltpu.SMEM),
            scratch_shapes=[pltpu.VMEM((8, tile_c), jnp.float32)],
        ),
        compiler_params=pltpu.CompilerParams(
            dimension_semantics=("parallel", "arbitrary"),
            vmem_limit_bytes=vmem_limit,
        ),
        cost_estimate=cost,
    )(features, labels)

    return jnp.sum(partials) / jnp.float32(b)


if __name__ == "__main__":
    key = jax.random.PRNGKey(0)
    k1, k2 = jax.random.split(key)

    B, C = 16, 128  # small shapes consistent with the (b, num_classes) spec

    # features must be strictly positive (they are log'd): use a softmax of
    # random logits, as a softmax-loss would see.
    logits = jax.random.normal(k1, (B, C), dtype=jnp.float32)
    features = jax.nn.softmax(logits, axis=-1)

    # labels: one-hot targets
    targets = jax.random.randint(k2, (B,), 0, C)
    labels = jax.nn.one_hot(targets, C, dtype=jnp.float32)

    loss = softmax_loss(features, labels)
    loss = jax.block_until_ready(loss)

    # reference in plain JAX
    ref = jnp.sum(-jnp.log(features) * labels) / B

    assert jnp.allclose(loss, ref, rtol=1e-5, atol=1e-5), (loss, ref)
    print("KERNEL_OK")
</pallas_src>

<mosaic_0001>
module attributes {stable_mosaic.version = 11 : i64} {
  func.func @kernel(%arg0: i32, %arg1: i32, %arg2: memref<16x128xf32, #tpu.memory_space<vmem>>, %arg3: memref<16x128xf32, #tpu.memory_space<vmem>>, %arg4: memref<1x1xf32, #tpu.memory_space<smem>>, %arg5: memref<8x128xf32, #tpu.memory_space<vmem>>) attributes {dimension_semantics = [#tpu.dimension_semantics<parallel>, #tpu.dimension_semantics<arbitrary>], iteration_bounds = array<i64: 1, 1>, scalar_prefetch = 0 : i64, scratch_operands = 1 : i64, tpu.core_type = #tpu.core_type<tc>, window_params = [{transform_indices = @transform_0, window_bounds = array<i64: 16, 128>}, {transform_indices = @transform_1, window_bounds = array<i64: 16, 128>}, {transform_indices = @transform_2, window_bounds = array<i64: 1, 1>}]} {
    %c0_i32 = arith.constant 0 : i32
    %0 = arith.cmpi eq, %arg1, %c0_i32 : i32
    %1 = arith.extui %0 : i1 to i32
    %c0_i32_0 = arith.constant 0 : i32
    %2 = arith.cmpi ne, %1, %c0_i32_0 : i32
    scf.if %2 {
      %cst_13 = arith.constant 0.000000e+00 : f32
      %21 = vector.broadcast %cst_13 : f32 to vector<8x128xf32>
      %c0_14 = arith.constant 0 : index
      %c0_15 = arith.constant 0 : index
      %22 = vector.load %arg5[%c0_14, %c0_15] : memref<8x128xf32, #tpu.memory_space<vmem>>, vector<8x128xf32>
      tpu.vector_store %arg5[%c0_14, %c0_15], %21 {strides = array<i32>} : memref<8x128xf32, #tpu.memory_space<vmem>>, vector<8x128xf32>,
    } else {
    }
    %c0 = arith.constant 0 : index
    %c0_1 = arith.constant 0 : index
    %3 = vector.load %arg2[%c0, %c0_1] : memref<16x128xf32, #tpu.memory_space<vmem>>, vector<16x128xf32>
    %c0_2 = arith.constant 0 : index
    %c0_3 = arith.constant 0 : index
    %4 = vector.load %arg3[%c0_2, %c0_3] : memref<16x128xf32, #tpu.memory_space<vmem>>, vector<16x128xf32>
    %cst = arith.constant 0.000000e+00 : f32
    %5 = vector.broadcast %cst : f32 to vector<16x128xf32>
    %6 = arith.cmpf one, %4, %5 : vector<16x128xf32>
    %7 = math.log %3 : vector<16x128xf32>
    %cst_4 = arith.constant 0.000000e+00 : f32
    %8 = vector.broadcast %cst_4 : f32 to vector<16x128xf32>
    %9 = arith.subf %8, %7 : vector<16x128xf32>
    %10 = arith.mulf %9, %4 : vector<16x128xf32>
    %cst_5 = arith.constant 0.000000e+00 : f32
    %11 = vector.broadcast %cst_5 : f32 to vector<16x128xf32>
    %12 = arith.select %6, %10, %11 : vector<16x128xi1>, vector<16x128xf32>
    %c0_6 = arith.constant 0 : index
    %c0_7 = arith.constant 0 : index
    %13 = vector.load %arg5[%c0_6, %c0_7] : memref<8x128xf32, #tpu.memory_space<vmem>>, vector<8x128xf32>
    %14 = vector.shape_cast %12 : vector<16x128xf32> to vector<2x8x128xf32>
    %cst_8 = arith.constant dense<0.000000e+00> : vector<8x128xf32>
    %15 = vector.multi_reduction <add>, %14, %cst_8 [0] : vector<2x8x128xf32> to vector<8x128xf32>
    %16 = arith.addf %13, %15 : vector<8x128xf32>
    %c0_9 = arith.constant 0 : index
    %c0_10 = arith.constant 0 : index
    %17 = vector.load %arg5[%c0_9, %c0_10] : memref<8x128xf32, #tpu.memory_space<vmem>>, vector<8x128xf32>
    tpu.vector_store %arg5[%c0_9, %c0_10], %16 {strides = array<i32>} : memref<8x128xf32, #tpu.memory_space<vmem>>, vector<8x128xf32>,
    %c0_i32_11 = arith.constant 0 : i32
    %18 = arith.cmpi eq, %arg1, %c0_i32_11 : i32
    %19 = arith.extui %18 : i1 to i32
    %c0_i32_12 = arith.constant 0 : i32
    %20 = arith.cmpi ne, %19, %c0_i32_12 : i32
    scf.if %20 {
      %c0_13 = arith.constant 0 : index
      %c0_14 = arith.constant 0 : index
      %21 = vector.load %arg5[%c0_13, %c0_14] : memref<8x128xf32, #tpu.memory_space<vmem>>, vector<8x128xf32>
      %22 = vector.shape_cast %21 : vector<8x128xf32> to vector<1x8x128xf32>
      %cst_15 = arith.constant dense<0.000000e+00> : vector<1xf32>
      %23 = vector.multi_reduction <add>, %22, %cst_15 [1, 2] : vector<1x8x128xf32> to vector<1xf32>
      %24 = vector.shape_cast %23 : vector<1xf32> to vector<1x1x1xf32>
      %25 = vector.extract %24[0, 0, 0] : f32 from vector<1x1x1xf32>
      %c0_16 = arith.constant 0 : index
      %c0_17 = arith.constant 0 : index
      %26 = memref.load %arg4[%c0_16, %c0_17] : memref<1x1xf32, #tpu.memory_space<smem>>
      memref.store %25, %arg4[%c0_16, %c0_17] : memref<1x1xf32, #tpu.memory_space<smem>>
    } else {
    }
    return
  }
  func.func @transform_0(%arg0: i32, %arg1: i32) -> (i32, i32) {
    %c0_i32 = arith.constant 0 : i32
    return %arg0, %arg1 : i32, i32
  }
  func.func @transform_1(%arg0: i32, %arg1: i32) -> (i32, i32) {
    %c0_i32 = arith.constant 0 : i32
    return %arg0, %arg1 : i32, i32
  }
  func.func @transform_2(%arg0: i32, %arg1: i32) -> (i32, i32) {
    %c0_i32 = arith.constant 0 : i32
    %c0_i32_0 = arith.constant 0 : i32
    return %c0_i32, %arg0 : i32, i32
  }
}

</mosaic_0001>

<bundles_post_ra>
// kernel: tpu_custom_call.1
= control target key start
LH: loop header
LB: loop body
LE: loop exit
PB: predicated region body
PF: predicated region fallthrough
CT: control target
= control target key end

     0   :  { %7 = vsyncpa [#allocation4], 0  ;;  %s189_s0 = inlined_call_operand.hbm [shape: f32[16,128], index: 0, kind: input, shape index: {}]   ;;  %s190_s1 = inlined_call_operand.hbm [shape: f32[16,128], index: 1, kind: input, shape index: {}]   ;;  %s191_s2 = inlined_call_operand.hbm [shape: f32[1,1], index: 2, kind: output, shape index: {}]  }
   0x1   :  { %8 = vsyncpa [#allocation7], 0 }
   0x2   :  { %9 = vsyncpa [#allocation5], 0  ;;  %s160_s9 = smov [#allocation3]  }
   0x3   :  { %s15_s10 = sshll.u32 %s160_s9, 4  ;;  %s16_s10 = int_to_ptr.vmem [resolvable:$true] %s15_s10 }
   0x4   :  { %s114_s11 = scalar_lea.vmem %s16_s10, 256  ;;  %p119_p1 = scmp.lt.s32.totalorder %s16_s10, %s16_s10 }
   0x5   :  { %p115_p0 = scmp.ne.s32.totalorder %s16_s10, %s114_s11  ;;  %p120_p2 = scmp.lt.s32.totalorder %s114_s11, %s114_s11 }
   0x7   :  { %p121_p3 = por %p120_p2, %p119_p1 }
   0x9   :  { %p122_p4 = pnand %p121_p3, %p115_p0 }
   0xb   :  { %125 = shalt.err (!%p122_p4)
}
   0xc   :  { %s161_s12 = smov 128   ;;  %s162_s13 = smov 8  }
   0xd   :  { %21 = dma.hbm_to_vmem [thread:$0]  %s189_s0, 256, %s16_s10, [#allocation4], %s161_s12, %s161_s12, %s162_s13  }
   0xe   :  { %s163_s16 = smov [#allocation6]  }
   0xf   :  { %s27_s17 = sshll.u32 %s163_s16, 4  ;;  %s28_s17 = int_to_ptr.vmem [resolvable:$true] %s27_s17 }
  0x10   :  { %s134_s18 = scalar_lea.vmem %s28_s17, 256  ;;  %p139_p6 = scmp.lt.s32.totalorder %s28_s17, %s28_s17 }
  0x11   :  { %p135_p5 = scmp.ne.s32.totalorder %s28_s17, %s134_s18  ;;  %p140_p7 = scmp.lt.s32.totalorder %s134_s18, %s134_s18 }
  0x13   :  { %p141_p8 = por %p140_p7, %p139_p6 }
  0x15   :  { %p142_p9 = pnand %p141_p8, %p135_p5 }
  0x17   :  { %145 = shalt.err (!%p142_p9)
}
  0x18   :  { %33 = dma.hbm_to_vmem [thread:$0]  %s190_s1, 256, %s28_s17, [#allocation7], %s161_s12, %s161_s12, %s162_s13  }
  0x19   :  { %154 = dma.done.wait [#allocation4], 256  }
  0x1a   :  { %155 = vsyncadd [#allocation4], 4294967040 }
  0x1b   :  { %156 = dma.done.wait [#allocation7], 256  }
  0x1c   :  { %157 = vsyncadd [#allocation7], 4294967040  ;;  %v45_v0 = vld [vmem:[#allocation3] sm:$0xff]  ;;  %v46_v1 = vld [vmem:[#allocation3 + $0x8] sm:$0xff]  ;;  %s164_s1 = smov [#allocation8]  }
  0x1d   :  { %102 = vlog2.f32 %v45_v0  ;;  %v47_v4 = vld [vmem:[#allocation6] sm:$0xff]  ;;  %v48_v6 = vld [vmem:[#allocation6 + $0x8] sm:$0xff] }
  0x1e   :  { %104 = vlog2.f32 %v46_v1  ;;  %vm49_vm0 = vcmp.ne.f32.partialorder %v47_v4, 0.0  ;;  %vm50_vm1 = vcmp.ne.f32.partialorder %v48_v6, 0.0 }
  0x2a   :  { %v103_v2 = vpop.eup %102 }
  0x2b   :  { %v105_v3 = vpop.eup %104  ;;  %v52_v5 = vmul.f32 0.6931472, %v103_v2 }
  0x2c   :  { %v54_v7 = vmul.f32 0.6931472, %v105_v3 }
  0x2d   :  { %v55_v8 = vsub.f32 0.0, %v52_v5 }
  0x2e   :  { %v56_v9 = vsub.f32 0.0, %v54_v7 }
  0x2f   :  { %v57_v10 = vmul.f32 %v55_v8, %v47_v4 }
  0x30   :  { %v58_v11 = vmul.f32 %v56_v9, %v48_v6 }
  0x31   :  { %v59_v12 = vsel %vm49_vm0, %v57_v10, 0.0 }
  0x32   :  { %v60_v13 = vsel %vm50_vm1, %v58_v11, 0.0 }
  0x33   :  { %v62_v14 = vadd.f32 %v60_v13, %v59_v12 }
  0x35   :  { %69 = vadd.xlane.f32.xlu0 %v62_v14 }
  0xbe   :  { %v70_v15 = vpop.xlane.xlu0 %69 }
  0xbf   :  { %v71_v16 = vrot.slane %v70_v15, 4 }
  0xc1   :  { %v72_v17 = vadd.f32 %v71_v16, %v70_v15 }
  0xc3   :  { %v73_v18 = vrot.slane %v72_v17, 2 }
  0xc5   :  { %v74_v19 = vadd.f32 %v73_v18, %v72_v17 }
  0xc7   :  { %v75_v20 = vrot.slane %v74_v19, 1 }
  0xc9   :  { %v76_v21 = vadd.f32 %v75_v20, %v74_v19 }
  0xcb   :  { %95 = vpush %v76_v21 }
  0xfc   :  { %s96_s0 = spop %95 }
  0xfd   :  { %79 = sst [smem:[#allocation8]] %s96_s0 }
  0xfe   :  { %87 = dma.smem_to_hbm %s164_s1, 16, %s191_s2, [#allocation5]  }
  0xff   :  { %158 = dma.done.wait [#allocation5], 16  }
 0x100   :  { %159 = vsyncadd [#allocation5], 4294967280 }
 0x101   :  { %91 = sfence }
 0x102   :  { %92 = vsyncpa [#allocation4], 1 }
 0x103   :  { %93 = vsyncpa [#allocation7], 1 }
 0x104   :  { %94 = vsyncpa [#allocation5], 1 }

</bundles_post_ra>
